<compile_context>
chip_gen: v7x
topology: tpu7x:2x2x1
jax: 0.10.0
libtpu: 0.0.40
codegen_flags: <defaults>
</compile_context>

<pallas_src>
import math

import jax
import jax.numpy as jnp
import numpy as np
from jax.experimental import pallas as pl
from jax.experimental.pallas import tpu as pltpu


def _pe_kernel(div_ref, o_ref):
    # div_ref: (1, D)   div_term repeated per-column: div_full[j] = div_term[j // 2]
    # o_ref  : (1, T, D) one seq-tile of the positional-embedding slice
    _, t, d = o_ref.shape
    base = pl.program_id(0) * t
    # Row index -> absolute position; column index -> even/odd (sin/cos) select.
    pos = (base + jax.lax.broadcasted_iota(jnp.int32, (t, d), 0)).astype(jnp.float32)
    col = jax.lax.broadcasted_iota(jnp.int32, (t, d), 1)
    angle = pos * div_ref[...]                       # (T, D) VPU broadcast multiply
    pe = jnp.where((col & 1) == 0, jnp.sin(angle), jnp.cos(angle))   # EUP + VPU select
    o_ref[0] = pe.astype(o_ref.dtype)


def _pick_seq_tile(seq_len):
    """Biggest tile that keeps blocks fat, divides seq_len, and is 8-aligned."""
    if seq_len <= 1024:
        return seq_len                      # single fat grid step
    for t in (1024, 512, 256, 128, 64, 32, 16, 8):
        if seq_len % t == 0:
            return t
    return seq_len                          # fallback: one full-extent block


def positional_embedding(x, d_model, max_len=5000, out_dtype=jnp.float32):
    """Equivalent of PositionalEmbedding(d_model, max_len).forward(x).

    x: array whose axis 1 is the sequence length (values of x are unused,
       exactly like the PyTorch forward). Returns (1, seq_len, d_model).
    """
    seq_len = x.shape[1]
    assert seq_len <= max_len, "sequence length exceeds max_len of the PE buffer"
    assert d_model % 2 == 0, "d_model must be even (as required by the PyTorch module)"

    # Host-side constant, identical construction to the PyTorch buffer init.
    div_term = np.exp(
        np.arange(0, d_model, 2, dtype=np.float32) * -(math.log(10000.0) / d_model)
    )
    div_full = jnp.asarray(np.repeat(div_term, 2)[None, :])          # (1, d_model)

    seq_tile = _pick_seq_tile(seq_len)
    grid = (seq_len // seq_tile,) if seq_len % seq_tile == 0 else (1,)
    if grid == (1,):
        seq_tile = seq_len

    out = pl.pallas_call(
        _pe_kernel,
        out_shape=jax.ShapeDtypeStruct((1, seq_len, d_model), out_dtype),
        grid=grid,
        in_specs=[
            pl.BlockSpec((1, d_model), lambda i: (0, 0)),             # VMEM-resident
        ],
        out_specs=pl.BlockSpec((1, seq_tile, d_model), lambda i: (0, i, 0)),
        compiler_params=pltpu.CompilerParams(dimension_semantics=("parallel",)),
    )(div_full)
    return out


if __name__ == "__main__":
    key = jax.random.PRNGKey(0)

    # Small shapes consistent with the module: x is [B, S, d_model]; forward only
    # reads x.size(1).
    B, S, d_model = 2, 16, 32
    x = jax.random.normal(key, (B, S, d_model), dtype=jnp.float32)

    out = positional_embedding(x, d_model=d_model, max_len=5000)
    out = jax.block_until_ready(out)

    # Pure-NumPy reference: exact PyTorch buffer construction, then slice.
    position = np.arange(5000, dtype=np.float32)[:, None]
    div_term = np.exp(
        np.arange(0, d_model, 2, dtype=np.float32) * -(math.log(10000.0) / d_model)
    )
    pe = np.zeros((5000, d_model), dtype=np.float32)
    pe[:, 0::2] = np.sin(position * div_term)
    pe[:, 1::2] = np.cos(position * div_term)
    ref = pe[None, :S, :]                                             # (1, S, d_model)

    assert out.shape == (1, S, d_model)
    np.testing.assert_allclose(np.asarray(out), ref, rtol=1e-5, atol=1e-5)

    print("KERNEL_OK")
</pallas_src>

<mosaic_0001>
module attributes {stable_mosaic.version = 11 : i64} {
  func.func @_pe_kernel(%arg0: i32, %arg1: memref<1x32xf32, #tpu.memory_space<vmem>>, %arg2: memref<1x16x32xf32, #tpu.memory_space<vmem>>) attributes {dimension_semantics = [#tpu.dimension_semantics<parallel>], iteration_bounds = array<i64: 1>, scalar_prefetch = 0 : i64, scratch_operands = 0 : i64, tpu.core_type = #tpu.core_type<tc>, window_params = [{pipeline_mode = #tpu.pipeline_mode<synchronous>, transform_indices = @transform_0, window_bounds = array<i64: 1, 32>}, {transform_indices = @transform_1, window_bounds = array<i64: 1, 16, 32>}]} {
    %c16_i32 = arith.constant 16 : i32
    %0 = arith.muli %arg0, %c16_i32 : i32
    %1 = tpu.iota {dimensions = array<i32: 0>} : vector<16x32xi32>
    %2 = vector.broadcast %0 : i32 to vector<16x32xi32>
    %3 = arith.addi %2, %1 : vector<16x32xi32>
    %4 = arith.sitofp %3 : vector<16x32xi32> to vector<16x32xf32>
    %5 = tpu.iota {dimensions = array<i32: 1>} : vector<16x32xi32>
    %c0 = arith.constant 0 : index
    %c0_0 = arith.constant 0 : index
    %6 = vector.load %arg1[%c0, %c0_0] : memref<1x32xf32, #tpu.memory_space<vmem>>, vector<1x32xf32>
    %7 = vector.broadcast %6 : vector<1x32xf32> to vector<16x32xf32>
    %8 = arith.mulf %4, %7 : vector<16x32xf32>
    %c1_i32 = arith.constant 1 : i32
    %9 = vector.broadcast %c1_i32 : i32 to vector<16x32xi32>
    %10 = arith.andi %5, %9 : vector<16x32xi32>
    %c0_i32 = arith.constant 0 : i32
    %11 = vector.broadcast %c0_i32 : i32 to vector<16x32xi32>
    %12 = arith.cmpi eq, %10, %11 : vector<16x32xi32>
    %13 = math.sin %8 : vector<16x32xf32>
    %14 = math.cos %8 : vector<16x32xf32>
    %15 = arith.select %12, %13, %14 : vector<16x32xi1>, vector<16x32xf32>
    %c0_1 = arith.constant 0 : index
    %c0_2 = arith.constant 0 : index
    %c0_3 = arith.constant 0 : index
    %16 = vector.load %arg2[%c0_1, %c0_2, %c0_3] : memref<1x16x32xf32, #tpu.memory_space<vmem>>, vector<1x16x32xf32>
    %17 = vector.shape_cast %16 : vector<1x16x32xf32> to vector<16x32xf32>
    %18 = vector.shape_cast %15 : vector<16x32xf32> to vector<1x16x32xf32>
    tpu.vector_store %arg2[%c0_1, %c0_2, %c0_3], %18 {strides = array<i32>} : memref<1x16x32xf32, #tpu.memory_space<vmem>>, vector<1x16x32xf32>,
    return
  }
  func.func @transform_0(%arg0: i32) -> (i32, i32) {
    %c0_i32 = arith.constant 0 : i32
    %c0_i32_0 = arith.constant 0 : i32
    %c0_i32_1 = arith.constant 0 : i32
    return %c0_i32, %c0_i32_0 : i32, i32
  }
  func.func @transform_1(%arg0: i32) -> (i32, i32, i32) {
    %c0_i32 = arith.constant 0 : i32
    %c0_i32_0 = arith.constant 0 : i32
    %c0_i32_1 = arith.constant 0 : i32
    return %c0_i32, %arg0, %c0_i32_0 : i32, i32, i32
  }
}

</mosaic_0001>

<bundles_post_ra>
// kernel: tpu_custom_call.1
= control target key start
LH: loop header
LB: loop body
LE: loop exit
PB: predicated region body
PF: predicated region fallthrough
CT: control target
= control target key end

     0   :  { %6 = vsyncpa [#allocation3], 0  ;;  %s696_s0 = inlined_call_operand.hbm [shape: f32[1,32], index: 0, kind: input, shape index: {}]   ;;  %s697_s1 = inlined_call_operand.hbm [shape: f32[1,16,32], index: 1, kind: output, shape index: {}]  }
   0x1   :  { %7 = vsyncpa [#allocation4], 0  ;;  %s570_s6 = smov [#allocation2]   ;;  %s522_s10 = scalar_lea.hbm %s696_s0, 16 }
   0x2   :  { %s14_s7 = sshll.u32 %s570_s6, 4  ;;  %p523_p0 = scmp.ne.s32.totalorder %s696_s0, %s522_s10  ;;  %s15_s7 = int_to_ptr.vmem [resolvable:$true] %s14_s7 }
   0x3   :  { %p526_p1 = scmp.lt.u32.totalorder %s522_s10, %s696_s0 }
   0x5   :  { %p528_p2 = pnand %p526_p1, %p523_p0 }
   0x7   :  { %531 = shalt.err (!%p528_p2)
}
   0x8   :  { %s532_s15 = scalar_lea.vmem %s15_s7, 16  ;;  %s536_s16 = scalar_lea.vmem %s15_s7, 32 }
   0x9   :  { %p533_p3 = scmp.ne.s32.totalorder %s15_s7, %s532_s15  ;;  %p537_p4 = scmp.lt.s32.totalorder %s15_s7, %s15_s7 }
   0xa   :  { %p538_p5 = scmp.lt.s32.totalorder %s536_s16, %s532_s15 }
   0xc   :  { %p539_p6 = por %p538_p5, %p537_p4 }
   0xe   :  { %p540_p7 = pnand %p539_p6, %p533_p3 }
  0x10   :  { %543 = shalt.err (!%p540_p7)
}
  0x11   :  { %17 = dma.hbm_to_vmem [thread:$0]  %s696_s0, 16, %s15_s7, [#allocation3]  }
  0x12   :  { %566 = dma.done.wait [#allocation3], 16  }
  0x13   :  { %567 = vsyncadd [#allocation3], 4294967280  ;;  %v22_v0 = vlaneseq  ;;  %v479_v5 = vld [vmem:[#allocation2] ss:$0 sm:$0xff]  ;;  %v571_v30 = vmov 683565275  }
  0x14   :  { %v572_v32 = vmov 2475754826   ;;  %v573_v34 = vmov 2131351028   ;;  %v574_v36 = vmov 2102212464  }
  0x15   :  { %v23_v1 = vshrl.u32 %v22_v0, 7  ;;  %v575_v38 = vmov 920167782   ;;  %v576_v46 = vmov 1326507024   ;;  %s577_s0 = smov [#allocation5]  }
  0x16   :  { %s467_s19 = sshll.u32 %s577_s0, 4  ;;  %s468_s19 = int_to_ptr.vmem [resolvable:$true] %s467_s19 }
  0x17   :  { %v24_v2 = vadd.s32 8, %v23_v1  ;;  %v28_v3 = vcvt.s32.f32 %v23_v1  ;;  %s544_s20 = scalar_lea.vmem %s468_s19, 256  ;;  %p549_p9 = scmp.lt.s32.totalorder %s468_s19, %s468_s19 }
  0x18   :  { %p545_p8 = scmp.ne.s32.totalorder %s468_s19, %s544_s20  ;;  %p550_p10 = scmp.lt.s32.totalorder %s544_s20, %s544_s20 }
  0x19   :  { %v29_v4 = vcvt.s32.f32 %v24_v2  ;;  %v603_v6 = vmul.f32 %v479_v5, %v28_v3 }
  0x1a   :  { %p551_p11 = por %p550_p10, %p549_p9 }
  0x1b   :  { %v605_v7 = vmul.f32 %v479_v5, %v29_v4  ;;  %v43_v8 = vand.u32 2147483647, %v603_v6  ;;  %v46_v9 = vand.u32 2139095040, %v603_v6  ;;  %vm45_vm14 = vcmp.lt.s32.totalorder %v603_v6, 0 }
  0x1c   :  { %p552_p12 = pnand %p551_p11, %p545_p8 }
  0x1d   :  { %v150_v10 = vand.u32 2139095040, %v605_v7  ;;  %v147_v11 = vand.u32 2147483647, %v605_v7  ;;  %v47_v12 = vshrl.u32 %v46_v9, 23  ;;  %v50_v13 = vand.u32 8388607, %v43_v8 }
  0x1e   :  { %vm44_vm15 = vcmp.le.f32.partialorder %v43_v8, 0.7853982 }
  0x1f   :  { %v151_v14 = vshrl.u32 %v150_v10, 23  ;;  %v154_v15 = vand.u32 8388607, %v147_v11  ;;  %v480_v16 = vadd.s32 4294967169, %v47_v12  ;;  %v51_v19 = vor.u32 8388608, %v50_v13 }
  0x21   :  { %v484_v17 = vadd.s32 4294967169, %v151_v14  ;;  %v53_v18 = vadd.s32 1, %v480_v16  ;;  %v155_v21 = vor.u32 8388608, %v154_v15  ;;  %v615_v26 = vshll.u32 %v51_v19, 8 }
  0x23   :  { %v157_v20 = vadd.s32 1, %v484_v17  ;;  %vm54_vm0 = vcmp.gt.s32.totalorder %v53_v18, 0  ;;  %v617_v28 = vshll.u32 %v155_v21, 8 }
  0x24   :  { %v55_v22 = vsel %vm54_vm0, %v53_v18, 0  ;;  %vm149_vm0 = vcmp.lt.s32.totalorder %v605_v7, 0 }
  0x25   :  { %vm158_vm1 = vcmp.gt.s32.totalorder %v157_v20, 0  ;;  %v56_v23 = vshrl.u32 %v55_v22, 5  ;;  %v57_v24 = vand.u32 31, %v55_v22 }
  0x26   :  { %v159_v25 = vsel %vm158_vm1, %v157_v20, 0  ;;  %vm148_vm1 = vcmp.le.f32.partialorder %v147_v11, 0.7853982 }
  0x27   :  { %v161_v27 = vand.u32 31, %v159_v25  ;;  %v58_v29 = vsub.s32 32, %v57_v24  ;;  %v60_v31 = vshll.u32 %v571_v30, %v57_v24  ;;  %v63_v33 = vshll.u32 %v572_v32, %v57_v24 }
  0x28   :  { %v66_v35 = vshll.u32 %v573_v34, %v57_v24  ;;  %v69_v37 = vshll.u32 %v574_v36, %v57_v24  ;;  %v72_v39 = vshll.u32 %v575_v38, %v57_v24  ;;  %vm75_vm2 = vcmp.lt.s32.totalorder %v56_v23, 1 }
  0x29   :  { %v619_v40 = vshrl.u32 %v159_v25, 5  ;;  %v59_v41 = vshrl.u32 %v571_v30, %v58_v29  ;;  %v61_v42 = vshrl.u32 %v572_v32, %v58_v29  ;;  %v64_v43 = vshrl.u32 %v573_v34, %v58_v29 }
  0x2a   :  { %v67_v44 = vshrl.u32 %v574_v36, %v58_v29  ;;  %v70_v45 = vshrl.u32 %v575_v38, %v58_v29  ;;  %v73_v47 = vshrl.u32 %v576_v46, %v58_v29  ;;  %vm76_vm3 = vcmp.lt.s32.totalorder %v56_v23, 2 }
  0x2b   :  { %vm78_vm4 = vcmp.lt.s32.totalorder %v56_v23, 4  ;;  %v62_v48 = vor.u32 %v61_v42, %v60_v31  ;;  %v65_v49 = vor.u32 %v64_v43, %v63_v33  ;;  %v162_v51 = vsub.s32 32, %v161_v27 }
  0x2c   :  { %v68_v50 = vor.u32 %v67_v44, %v66_v35  ;;  %v71_v52 = vor.u32 %v70_v45, %v69_v37  ;;  %v74_v53 = vor.u32 %v73_v47, %v72_v39  ;;  %vm77_vm5 = vcmp.lt.s32.totalorder %v56_v23, 3 }
  0x2d   :  { %v164_v54 = vshll.u32 %v571_v30, %v161_v27  ;;  %v79_v55 = vsel %vm75_vm2, %v59_v41, %v62_v48  ;;  %v83_v57 = vsel %vm75_vm2, %v62_v48, %v65_v49  ;;  %v167_v62 = vshll.u32 %v572_v32, %v161_v27 }
  0x2e   :  { %v80_v56 = vsel %vm78_vm4, %v68_v50, 2102212464  ;;  %v87_v58 = vsel %vm75_vm2, %v65_v49, %v68_v50  ;;  %v84_v60 = vsel %vm78_vm4, %v71_v52, 920167782  ;;  %v88_v61 = vsel %vm78_vm4, %v74_v53, 1326507024 }
  0x2f   :  { %v81_v59 = vsel %vm77_vm5, %v65_v49, %v80_v56  ;;  %v85_v63 = vsel %vm77_vm5, %v68_v50, %v84_v60  ;;  %v89_v1 = vsel %vm77_vm5, %v71_v52, %v88_v61  ;;  %v163_v2 = vshrl.u32 %v571_v30, %v162_v51 }
  0x30   :  { %v165_v3 = vshrl.u32 %v572_v32, %v162_v51  ;;  %v82_v4 = vsel %vm76_vm3, %v79_v55, %v81_v59  ;;  %v86_v5 = vsel %vm76_vm3, %v83_v57, %v85_v63  ;;  %v90_v9 = vsel %vm76_vm3, %v87_v58, %v89_v1 }
  0x31   :  { %v168_v10 = vshrl.u32 %v573_v34, %v162_v51  ;;  %v628_v12 = vmul.u32.u64.low %v615_v26, %v90_v9  ;;  %v629_v13 = vmul.u32.u64.high %v615_v26, %v90_v9, %v628_v12  ;;  %v170_v18 = vshll.u32 %v573_v34, %v161_v27 }
  0x32   :  { %v632_v14 = vmul.u32.u64.low %v615_v26, %v86_v5  ;;  %v633_v15 = vmul.u32.u64.high %v615_v26, %v86_v5, %v632_v14  ;;  %v166_v16 = vor.u32 %v165_v3, %v164_v54  ;;  %v171_v19 = vshrl.u32 %v574_v36, %v162_v51 }
  0x33   :  { %v169_v17 = vor.u32 %v168_v10, %v167_v62  ;;  %v173_v20 = vshll.u32 %v574_v36, %v161_v27  ;;  %v174_v21 = vshrl.u32 %v575_v38, %v162_v51  ;;  %v176_v22 = vshll.u32 %v575_v38, %v161_v27 }
  0x34   :  { %v177_v24 = vshrl.u32 %v576_v46, %v162_v51  ;;  %v98_v23 = vmul.u32 %v615_v26, %v82_v4  ;;  %v172_v25 = vor.u32 %v171_v19, %v170_v18  ;;  %vm179_vm6 = vcmp.lt.s32.totalorder %v619_v40, 1 }
  0x35   :  { %vm180_vm7 = vcmp.lt.s32.totalorder %v619_v40, 2  ;;  %vm100_vm8 = vc.u32 %v629_v13, %v632_v14  ;;  %v101_v29 = vadd.s32 1, %v633_v15  ;;  %v175_v30 = vor.u32 %v174_v21, %v173_v20 }
  0x36   :  { %vm181_vm9 = vcmp.lt.s32.totalorder %v619_v40, 3  ;;  %v178_v31 = vor.u32 %v177_v24, %v176_v22  ;;  %vm182_vm10 = vcmp.lt.s32.totalorder %v619_v40, 4  ;;  %v183_v32 = vsel %vm179_vm6, %v163_v2, %v166_v16 }
  0x37   :  { %v187_v27 = vsel %vm179_vm6, %v166_v16, %v169_v17  ;;  %v102_v33 = vsel %vm100_vm8, %v101_v29, %v633_v15  ;;  %v184_v26 = vsel %vm182_vm10, %v172_v25, 2102212464  ;;  %v188_v34 = vsel %vm182_vm10, %v175_v30, 920167782 }
  0x38   :  { %v191_v35 = vsel %vm179_vm6, %v169_v17, %v172_v25  ;;  %v103_v36 = vadd.s32 %v102_v33, %v98_v23  ;;  %v185_v37 = vsel %vm181_vm9, %v169_v17, %v184_v26  ;;  %v189_v38 = vsel %vm181_vm9, %v172_v25, %v188_v34 }
  0x39   :  { %v192_v39 = vsel %vm182_vm10, %v178_v31, 1326507024  ;;  %v186_v41 = vsel %vm180_vm7, %v183_v32, %v185_v37  ;;  %v190_v42 = vsel %vm180_vm7, %v187_v27, %v189_v38  ;;  %v99_v1 = vadd.s32 %v632_v14, %v629_v13 }
  0x3a   :  { %v193_v43 = vsel %vm181_vm9, %v175_v30, %v192_v39  ;;  %v104_v44 = vadd.s32 536870912, %v103_v36  ;;  %v650_v46 = vmul.u32.u64.low %v617_v28, %v190_v42  ;;  %v651_v47 = vmul.u32.u64.high %v617_v28, %v190_v42, %v650_v46 }
  0x3b   :  { %v194_v45 = vsel %vm180_vm7, %v191_v35, %v193_v43  ;;  %v202_v51 = vmul.u32 %v617_v28, %v186_v41  ;;  %vm135_vm8 = vweird.f32 %v603_v6  ;;  %vm459_vm10 = vcmask 261120  }
  0x3c   :  { %v654_v48 = vmul.u32.u64.low %v617_v28, %v194_v45  ;;  %v655_v49 = vmul.u32.u64.high %v617_v28, %v194_v45, %v654_v48  ;;  %v105_v50 = vshrl.u32 %v104_v44, 30  ;;  %v205_v53 = vadd.s32 1, %v651_v47 }
  0x3d   :  { %v31_v45 = vand.u32 127, %v22_v0 }
  0x3e   :  { %v106_v52 = vshll.u32 %v105_v50, 30  ;;  %vm204_vm11 = vc.u32 %v655_v49, %v650_v46  ;;  %v203_v21 = vadd.s32 %v650_v46, %v655_v49  ;;  %v129_v13 = vsub.s32 4, %v105_v50 }
  0x3f   :  { %v206_v40 = vsel %vm204_vm11, %v205_v53, %v651_v47 }
  0x40   :  { %v107_v54 = vsub.s32 %v103_v36, %v106_v52  ;;  %v207_v55 = vadd.s32 %v206_v40, %v202_v51  ;;  %v130_v27 = vsel %vm45_vm14, %v129_v13, %v105_v50  ;;  %v41_v52 = vand.u32 1, %v31_v45 }
  0x41   :  { %v132_v36 = vsel %vm44_vm15, 0, %v130_v27 }
  0x42   :  { %v109_v56 = vsub.s32 0, %v107_v54  ;;  %v208_v57 = vadd.s32 536870912, %v207_v55  ;;  %v136_v42 = vadd.s32 3, %v132_v36  ;;  %v344_v47 = vand.u32 3, %v132_v36 }
  0x43   :  { %vm673_vm9 = vcmp.eq.s32.totalorder %v41_v52, 0 }
  0x44   :  { %v481_v58 = vmin.u32 %v109_v56, %v107_v54  ;;  %v209_v59 = vshrl.u32 %v208_v57, 30  ;;  %v137_v46 = vand.u32 3, %v136_v42  ;;  %vm349_vm3 = vcmp.eq.s32.totalorder %v344_v47, 2 }
  0x45   :  { %vm346_vm5 = vcmp.eq.s32.totalorder %v344_v47, 0  ;;  %vm345_vm7 = vcmp.lt.s32.totalorder %v344_v47, 2 }
  0x46   :  { %v111_v60 = vclz %v481_v58  ;;  %v210_v61 = vshll.u32 %v209_v59, 30  ;;  %v233_v41 = vsub.s32 4, %v209_v59  ;;  %vm142_vm2 = vcmp.eq.s32.totalorder %v137_v46, 2 }
  0x47   :  { %vm139_vm4 = vcmp.eq.s32.totalorder %v137_v46, 0  ;;  %vm138_vm6 = vcmp.lt.s32.totalorder %v137_v46, 2 }
  0x48   :  { %v482_v62 = vadd.s32 4294967294, %v111_v60  ;;  %v211_v63 = vsub.s32 %v207_v55, %v210_v61  ;;  %v234_v44 = vsel %vm149_vm0, %v233_v41, %v209_v59 }
  0x49   :  { %v236_v50 = vsel %vm148_vm1, 0, %v234_v44 }
  0x4a   :  { %vm483_vm12 = vcmp.lt.s32.totalorder %v482_v62, 0  ;;  %v213_v2 = vsub.s32 0, %v211_v63  ;;  %v240_v11 = vadd.s32 3, %v236_v50 }
  0x4b   :  { %v114_v28 = vsel %vm483_vm12, 0, %v482_v62  ;;  %v447_v62 = vand.u32 3, %v236_v50 }
  0x4c   :  { %v115_v3 = vsub.s32 32, %v114_v28  ;;  %v116_v4 = vshll.u32 %v107_v54, %v114_v28  ;;  %v119_v5 = vsub.s32 4294967266, %v114_v28  ;;  %v485_v9 = vmin.u32 %v213_v2, %v211_v63 }
  0x4d   :  { %v241_v61 = vand.u32 3, %v240_v11  ;;  %vm452_vm12 = vcmp.eq.s32.totalorder %v447_v62, 2 }
  0x4e   :  { %v117_v10 = vshrl.u32 %v99_v1, %v115_v3  ;;  %v120_v12 = vadd.s32 127, %v119_v5  ;;  %v215_v15 = vclz %v485_v9 }
  0x4f   :  { %vm246_vm11 = vcmp.eq.s32.totalorder %v241_v61, 2 }
  0x50   :  { %v118_v16 = vor.u32 %v117_v10, %v116_v4  ;;  %v121_v17 = vshll.u32 %v120_v12, 23  ;;  %v486_v18 = vadd.s32 4294967294, %v215_v15 }
  0x52   :  { %v122_v19 = vor.u32 4788187, %v121_v17  ;;  %v125_v20 = vcvt.s32.f32 %v118_v16  ;;  %vm487_vm13 = vcmp.lt.s32.totalorder %v486_v18, 0 }
  0x53   :  { %v218_v14 = vsel %vm487_vm13, 0, %v486_v18  ;;  %vm243_vm13 = vcmp.eq.s32.totalorder %v241_v61, 0 }
  0x54   :  { %v123_v22 = vand.u32 2147483647, %v122_v19  ;;  %v219_v24 = vsub.s32 32, %v218_v14  ;;  %v220_v23 = vshll.u32 %v211_v63, %v218_v14  ;;  %v223_v25 = vsub.s32 4294967266, %v218_v14 }
  0x56   :  { %v126_v29 = vmul.f32 %v125_v20, %v123_v22  ;;  %v221_v30 = vshrl.u32 %v203_v21, %v219_v24  ;;  %v224_v31 = vadd.s32 127, %v223_v25 }
  0x58   :  { %v127_v32 = vxor.u32 2147483648, %v126_v29  ;;  %v222_v33 = vor.u32 %v221_v30, %v220_v23  ;;  %v225_v26 = vshll.u32 %v224_v31, 23 }
  0x5a   :  { %v128_v34 = vsel %vm45_vm14, %v127_v32, %v126_v29  ;;  %v226_v37 = vor.u32 4788187, %v225_v26  ;;  %v229_v38 = vcvt.s32.f32 %v222_v33  ;;  %vm449_vm14 = vcmp.eq.s32.totalorder %v447_v62, 0 }
  0x5b   :  { %v131_v35 = vsel %vm44_vm15, %v603_v6, %v128_v34  ;;  %vm242_vm15 = vcmp.lt.s32.totalorder %v241_v61, 2 }
  0x5c   :  { %514 = vcosq.f32 %v131_v35  ;;  %v227_v39 = vand.u32 2147483647, %v226_v37 }
  0x5d   :  { %516 = vsinq.f32 %v131_v35 }
  0x5e   :  { %v230_v43 = vmul.f32 %v229_v38, %v227_v39 }
  0x60   :  { %v231_v8 = vxor.u32 2147483648, %v230_v43 }
  0x62   :  { %v232_v48 = vsel %vm149_vm0, %v231_v8, %v230_v43  ;;  %vm448_vm0 = vcmp.lt.s32.totalorder %v447_v62, 2 }
  0x63   :  { %v235_v49 = vsel %vm148_vm1, %v605_v7, %v232_v48  ;;  %vm239_vm1 = vweird.f32 %v605_v7 }
  0x64   :  { %518 = vcosq.f32 %v235_v49 }
  0x65   :  { %520 = vsinq.f32 %v235_v49 }
  0x66   :  { %v515_v51 = vpop.eup %514 }
  0x67   :  { %v517_v53 = vpop.eup %516  ;;  %v143_v54 = vxor.u32 2147483648, %v515_v51 }
  0x68   :  { %v140_v40 = vxor.u32 2147483648, %v517_v53 }
  0x69   :  { %v144_v0 = vsel %vm142_vm2, %v143_v54, %v517_v53  ;;  %v351_v55 = vsel %vm349_vm3, %v143_v54, %v517_v53 }
  0x6a   :  { %v141_v57 = vsel %vm139_vm4, %v515_v51, %v140_v40  ;;  %v348_v58 = vsel %vm346_vm5, %v515_v51, %v140_v40 }
  0x6b   :  { %v145_v59 = vsel %vm138_vm6, %v141_v57, %v144_v0  ;;  %v352_v60 = vsel %vm345_vm7, %v348_v58, %v351_v55 }
  0x6c   :  { %v146_v63 = vsel %vm135_vm8, nan, %v145_v59  ;;  %v353_v1 = vsel %vm135_vm8, nan, %v352_v60 }
  0x6d   :  { %v457_v28 = vsel %vm673_vm9, %v146_v63, %v353_v1 }
  0x6e   :  { %460 = vst.msk [vmem:[#allocation5] sm:$0xff] %vm459_vm10, %v457_v28  ;;  %v519_v6 = vpop.eup %518 }
  0x6f   :  { %v521_v2 = vpop.eup %520  ;;  %v247_v3 = vxor.u32 2147483648, %v519_v6 }
  0x70   :  { %v244_v4 = vxor.u32 2147483648, %v521_v2 }
  0x71   :  { %v248_v5 = vsel %vm246_vm11, %v247_v3, %v521_v2  ;;  %v454_v9 = vsel %vm452_vm12, %v247_v3, %v521_v2 }
  0x72   :  { %v245_v10 = vsel %vm243_vm13, %v519_v6, %v244_v4  ;;  %v451_v12 = vsel %vm449_vm14, %v519_v6, %v244_v4 }
  0x73   :  { %v249_v15 = vsel %vm242_vm15, %v245_v10, %v248_v5  ;;  %v455_v16 = vsel %vm448_vm0, %v451_v12, %v454_v9 }
  0x74   :  { %v250_v17 = vsel %vm239_vm1, nan, %v249_v15  ;;  %v456_v18 = vsel %vm239_vm1, nan, %v455_v16 }
  0x75   :  { %v458_v19 = vsel %vm673_vm9, %v250_v17, %v456_v18 }
  0x76   :  { %461 = vst.msk [vmem:[#allocation5 + $0x8] sm:$0xff] %vm459_vm10, %v458_v19 }
  0x77   :  { %555 = shalt.err (!%p552_p12)
}
  0x78   :  { %s556_s23 = scalar_lea.hbm %s697_s1, 256 }
  0x79   :  { %p557_p13 = scmp.ne.s32.totalorder %s697_s1, %s556_s23  ;;  %p560_p0 = scmp.lt.u32.totalorder %s556_s23, %s697_s1 }
  0x7b   :  { %p562_p1 = pnand %p560_p0, %p557_p13 }
  0x7d   :  { %565 = shalt.err (!%p562_p1)
}
  0x7e   :  { %s578_s28 = smov 128   ;;  %s579_s29 = smov 8  }
  0x7f   :  { %473 = dma.vmem_to_hbm [thread:$0]  %s468_s19, 256, %s697_s1, [#allocation4], %s578_s28, %s578_s28, %s579_s29  }
  0x80   :  { %568 = dma.done.wait [#allocation4], 256  }
  0x81   :  { %569 = vsyncadd [#allocation4], 4294967040 }
  0x82   :  { %477 = vsyncpa [#allocation3], 1 }
  0x83   :  { %478 = vsyncpa [#allocation4], 1 }

</bundles_post_ra>
